<compile_context>
chip_gen: v7x
topology: tpu7x:2x2x1
jax: 0.10.0
libtpu: 0.0.40
codegen_flags: <defaults>
</compile_context>

<pallas_src>
import functools

import jax
import jax.numpy as jnp
from jax.experimental import pallas as pl
from jax.experimental.pallas import tpu as pltpu


def _se_kernel(x_ref, w1t_ref, b1_ref, w2t_ref, b2_ref, o_ref, *, inv_t):
    # x_ref block: (bb, C, T) -- C on sublanes, T on lanes, full extents.
    x = x_ref[...].astype(jnp.float32)                              # (bb, C, T) f32

    # Squeeze: per-channel mean via a lane-axis (T) reduction -> (bb, C).
    mean = jnp.sum(x, axis=-1) * inv_t                              # (bb, C) f32

    # Excite: 1x1 convs as tiny lane-dense row-vector matmuls (weights pre-transposed).
    h = jnp.dot(mean, w1t_ref[...],
                preferred_element_type=jnp.float32) + b1_ref[...]   # (bb, Cr)
    h = jnp.maximum(h, 0.0)
    s = jnp.dot(h, w2t_ref[...],
                preferred_element_type=jnp.float32) + b2_ref[...]   # (bb, C)
    s = jax.nn.sigmoid(s)

    # Scale: broadcast the (bb, C) gate over T with a VPU multiply; cast only at the store.
    o_ref[...] = (x * s[:, :, None]).astype(o_ref.dtype)


def se_module(x, w1, b1, w2, b2, *, block_batch=None):
    """Squeeze-and-Excitation forward matching the PyTorch SEModule.

    x : (B, C, T)      NCW activations
    w1: (C//r, C)      Conv1d(C, C//r, k=1) weight with the kernel dim squeezed
    b1: (C//r,)        Conv1d bias
    w2: (C, C//r)      Conv1d(C//r, C, k=1) weight with the kernel dim squeezed
    b2: (C,)           Conv1d bias
    """
    B, C, T = x.shape
    Cr = w1.shape[0]
    itemsize = x.dtype.itemsize
    slab_bytes = C * T * itemsize

    if block_batch is None:
        # Target ~4 MiB of input per grid step (measured ~85% HBM roofline at 1-4 MiB blocks),
        # while keeping >=4 grid steps when B allows so input DMA of i+1 / writeback of i-1
        # overlap the multiply of i, and so v7x's 2 TensorCores both get "parallel" blocks.
        target = 4 << 20
        bb = max(1, min(B, target // max(slab_bytes, 1)))
        if B >= 4:
            bb = min(bb, B // 4)
        elif B >= 2:
            bb = min(bb, B // 2)
        bb = max(bb, 1)
        while B % bb:
            bb -= 1
    else:
        bb = block_batch
        assert B % bb == 0
    grid = (B // bb,)

    # Pre-transposed weights / row biases so the excite math is lane-dense row-vector work.
    w1t = w1.astype(jnp.float32).T           # (C, Cr)
    b1r = b1.astype(jnp.float32).reshape(1, Cr)
    w2t = w2.astype(jnp.float32).T           # (Cr, C)
    b2r = b2.astype(jnp.float32).reshape(1, C)

    kernel = functools.partial(_se_kernel, inv_t=1.0 / T)

    # Purely bandwidth-bound: ~read + write of the slab; excite FLOPs are negligible.
    cost = pl.CostEstimate(
        flops=2 * B * C * T + 4 * B * C * Cr,
        transcendentals=B * C,
        bytes_accessed=2 * B * C * T * itemsize,
    )

    out = pl.pallas_call(
        kernel,
        out_shape=jax.ShapeDtypeStruct((B, C, T), x.dtype),
        grid_spec=pltpu.PrefetchScalarGridSpec(
            num_scalar_prefetch=0,
            grid=grid,
            in_specs=[
                pl.BlockSpec((bb, C, T), lambda i: (i, 0, 0)),   # activation slabs
                pl.BlockSpec((C, Cr), lambda i: (0, 0)),         # conv1 weight^T
                pl.BlockSpec((1, Cr), lambda i: (0, 0)),         # conv1 bias (row)
                pl.BlockSpec((Cr, C), lambda i: (0, 0)),         # conv2 weight^T
                pl.BlockSpec((1, C), lambda i: (0, 0)),          # conv2 bias (row)
            ],
            out_specs=pl.BlockSpec((bb, C, T), lambda i: (i, 0, 0)),
        ),
        compiler_params=pltpu.CompilerParams(
            dimension_semantics=("parallel",),
            # Double-buffered in+out blocks are ~4*bb*C*T*itemsize <= ~16 MiB with the 4 MiB
            # target, so 32 MiB is ample headroom on v5e/v6e (128 MiB) and v7x (64 MiB).
            vmem_limit_bytes=32 * 1024 * 1024,
        ),
        cost_estimate=cost,
        # Note: input_output_aliases={0: 0} is possible if the caller tolerates in-place update.
    )(x, w1t, b1r, w2t, b2r)

    return out


def se_module_ref(x, w1, b1, w2, b2):
    """Pure-JAX reference matching the PyTorch forward."""
    mean = jnp.mean(x, axis=-1, keepdims=True)                          # (B, C, 1)
    h = jnp.einsum("oc,bci->boi", w1, mean) + b1[None, :, None]         # (B, C//r, 1)
    h = jnp.maximum(h, 0.0)
    s = jnp.einsum("co,boi->bci", w2, h) + b2[None, :, None]            # (B, C, 1)
    s = jax.nn.sigmoid(s)
    return x * s


if __name__ == "__main__":
    def run_case(key, B, C, T, SE_ratio):
        Cr = C // SE_ratio
        k_x, k_w1, k_b1, k_w2, k_b2 = jax.random.split(key, 5)
        x = jax.random.normal(k_x, (B, C, T), dtype=jnp.float32)
        w1 = jax.random.normal(k_w1, (Cr, C), dtype=jnp.float32) * 0.1
        b1 = jax.random.normal(k_b1, (Cr,), dtype=jnp.float32) * 0.1
        w2 = jax.random.normal(k_w2, (C, Cr), dtype=jnp.float32) * 0.1
        b2 = jax.random.normal(k_b2, (C,), dtype=jnp.float32) * 0.1

        out = jax.block_until_ready(se_module(x, w1, b1, w2, b2))
        ref = se_module_ref(x, w1, b1, w2, b2)
        assert out.shape == (B, C, T)
        assert jnp.allclose(out, ref, atol=1e-4, rtol=1e-4), f"mismatch B={B} C={C} T={T}"

    key = jax.random.PRNGKey(0)
    k1, k2 = jax.random.split(key)
    run_case(k1, B=2, C=32, T=16, SE_ratio=8)   # toy shape: bb=1, grid=(2,)
    run_case(k2, B=8, C=64, T=32, SE_ratio=8)   # folded batches: bb=2, grid=(4,)
    print("KERNEL_OK")
</pallas_src>

<mosaic_0001>
module attributes {stable_mosaic.version = 11 : i64} {
  func.func @_se_kernel(%arg0: i32, %arg1: memref<1x32x16xf32, #tpu.memory_space<vmem>>, %arg2: memref<32x4xf32, #tpu.memory_space<vmem>>, %arg3: memref<1x4xf32, #tpu.memory_space<vmem>>, %arg4: memref<4x32xf32, #tpu.memory_space<vmem>>, %arg5: memref<1x32xf32, #tpu.memory_space<vmem>>, %arg6: memref<1x32x16xf32, #tpu.memory_space<vmem>>) attributes {dimension_semantics = [#tpu.dimension_semantics<parallel>], iteration_bounds = array<i64: 2>, scalar_prefetch = 0 : i64, scratch_operands = 0 : i64, tpu.core_type = #tpu.core_type<tc>, window_params = [{transform_indices = @transform_0, window_bounds = array<i64: 1, 32, 16>}, {pipeline_mode = #tpu.pipeline_mode<synchronous>, transform_indices = @transform_1, window_bounds = array<i64: 32, 4>}, {pipeline_mode = #tpu.pipeline_mode<synchronous>, transform_indices = @transform_2, window_bounds = array<i64: 1, 4>}, {pipeline_mode = #tpu.pipeline_mode<synchronous>, transform_indices = @transform_3, window_bounds = array<i64: 4, 32>}, {pipeline_mode = #tpu.pipeline_mode<synchronous>, transform_indices = @transform_4, window_bounds = array<i64: 1, 32>}, {transform_indices = @transform_5, window_bounds = array<i64: 1, 32, 16>}]} {
    %c0 = arith.constant 0 : index
    %c0_0 = arith.constant 0 : index
    %c0_1 = arith.constant 0 : index
    %0 = vector.load %arg1[%c0, %c0_0, %c0_1] : memref<1x32x16xf32, #tpu.memory_space<vmem>>, vector<1x32x16xf32>
    %cst = arith.constant dense<0.000000e+00> : vector<1x32xf32>
    %1 = vector.multi_reduction <add>, %0, %cst [2] : vector<1x32x16xf32> to vector<1x32xf32>
    %cst_2 = arith.constant 6.250000e-02 : f32
    %2 = vector.broadcast %cst_2 : f32 to vector<1x32xf32>
    %3 = arith.mulf %1, %2 : vector<1x32xf32>
    %c0_3 = arith.constant 0 : index
    %c0_4 = arith.constant 0 : index
    %4 = vector.load %arg2[%c0_3, %c0_4] : memref<32x4xf32, #tpu.memory_space<vmem>>, vector<32x4xf32>
    %cst_5 = arith.constant dense<0.000000e+00> : vector<1x4xf32>
    %5 = tpu.matmul %3, %4, %cst_5 {dimension_numbers = #tpu.dot_dimension_numbers<[1], [0], [0], [1], [0, 0, 1, 1], [], []>} : vector<1x32xf32>, vector<32x4xf32>, vector<1x4xf32> -> vector<1x4xf32>
    %c0_6 = arith.constant 0 : index
    %c0_7 = arith.constant 0 : index
    %6 = vector.load %arg3[%c0_6, %c0_7] : memref<1x4xf32, #tpu.memory_space<vmem>>, vector<1x4xf32>
    %7 = arith.addf %5, %6 : vector<1x4xf32>
    %cst_8 = arith.constant 0.000000e+00 : f32
    %8 = vector.broadcast %cst_8 : f32 to vector<1x4xf32>
    %9 = arith.maximumf %7, %8 : vector<1x4xf32>
    %c0_9 = arith.constant 0 : index
    %c0_10 = arith.constant 0 : index
    %10 = vector.load %arg4[%c0_9, %c0_10] : memref<4x32xf32, #tpu.memory_space<vmem>>, vector<4x32xf32>
    %cst_11 = arith.constant dense<0.000000e+00> : vector<1x32xf32>
    %11 = tpu.matmul %9, %10, %cst_11 {dimension_numbers = #tpu.dot_dimension_numbers<[1], [0], [0], [1], [0, 0, 1, 1], [], []>} : vector<1x4xf32>, vector<4x32xf32>, vector<1x32xf32> -> vector<1x32xf32>
    %c0_12 = arith.constant 0 : index
    %c0_13 = arith.constant 0 : index
    %12 = vector.load %arg5[%c0_12, %c0_13] : memref<1x32xf32, #tpu.memory_space<vmem>>, vector<1x32xf32>
    %13 = arith.addf %11, %12 : vector<1x32xf32>
    %14 = arith.negf %13 : vector<1x32xf32>
    %15 = math.exp %14 : vector<1x32xf32>
    %cst_14 = arith.constant 1.000000e+00 : f32
    %16 = vector.broadcast %cst_14 : f32 to vector<1x32xf32>
    %17 = arith.addf %16, %15 : vector<1x32xf32>
    %18 = arith.divf %16, %17 : vector<1x32xf32>
    %19 = vector.shape_cast %18 : vector<1x32xf32> to vector<1x32x1xf32>
    %20 = vector.broadcast %19 : vector<1x32x1xf32> to vector<1x32x16xf32>
    %21 = arith.mulf %0, %20 : vector<1x32x16xf32>
    %c0_15 = arith.constant 0 : index
    %c0_16 = arith.constant 0 : index
    %c0_17 = arith.constant 0 : index
    %22 = vector.load %arg6[%c0_15, %c0_16, %c0_17] : memref<1x32x16xf32, #tpu.memory_space<vmem>>, vector<1x32x16xf32>
    tpu.vector_store %arg6[%c0_15, %c0_16, %c0_17], %21 {strides = array<i32>} : memref<1x32x16xf32, #tpu.memory_space<vmem>>, vector<1x32x16xf32>,
    return
  }
  func.func @transform_0(%arg0: i32) -> (i32, i32, i32) {
    %c0_i32 = arith.constant 0 : i32
    %c0_i32_0 = arith.constant 0 : i32
    %c0_i32_1 = arith.constant 0 : i32
    return %arg0, %c0_i32, %c0_i32_0 : i32, i32, i32
  }
  func.func @transform_1(%arg0: i32) -> (i32, i32) {
    %c0_i32 = arith.constant 0 : i32
    %c0_i32_0 = arith.constant 0 : i32
    %c0_i32_1 = arith.constant 0 : i32
    return %c0_i32, %c0_i32_0 : i32, i32
  }
  func.func @transform_2(%arg0: i32) -> (i32, i32) {
    %c0_i32 = arith.constant 0 : i32
    %c0_i32_0 = arith.constant 0 : i32
    %c0_i32_1 = arith.constant 0 : i32
    return %c0_i32, %c0_i32_0 : i32, i32
  }
  func.func @transform_3(%arg0: i32) -> (i32, i32) {
    %c0_i32 = arith.constant 0 : i32
    %c0_i32_0 = arith.constant 0 : i32
    %c0_i32_1 = arith.constant 0 : i32
    return %c0_i32, %c0_i32_0 : i32, i32
  }
  func.func @transform_4(%arg0: i32) -> (i32, i32) {
    %c0_i32 = arith.constant 0 : i32
    %c0_i32_0 = arith.constant 0 : i32
    %c0_i32_1 = arith.constant 0 : i32
    return %c0_i32, %c0_i32_0 : i32, i32
  }
  func.func @transform_5(%arg0: i32) -> (i32, i32, i32) {
    %c0_i32 = arith.constant 0 : i32
    %c0_i32_0 = arith.constant 0 : i32
    %c0_i32_1 = arith.constant 0 : i32
    return %arg0, %c0_i32, %c0_i32_0 : i32, i32, i32
  }
}

</mosaic_0001>

<bundles_post_ra>
// kernel: tpu_custom_call.1
= control target key start
LH: loop header
LB: loop body
LE: loop exit
PB: predicated region body
PF: predicated region fallthrough
CT: control target
= control target key end

     0   :  { %s626_s18 = smov 0   ;;  %s695_s0 = inlined_call_operand.vmem [shape: f32[2,32,16], index: 0, kind: input, shape index: {}]   ;;  %s696_s1 = inlined_call_operand.vmem [shape: f32[32,4], index: 1, kind: input, shape index: {}]   ;;  %s697_s2 = inlined_call_operand.vmem [shape: f32[1,4], index: 2, kind: input, shape index: {}]   ;;  %s698_s3 = inlined_call_operand.vmem [shape: f32[4,32], index: 3, kind: input, shape index: {}]   ;;  %s699_s4 = inlined_call_operand.vmem [shape: f32[1,32], index: 4, kind: input, shape index: {}]   ;;  %s700_s5 = inlined_call_operand.vmem [shape: f32[2,32,16], index: 5, kind: output, shape index: {}]  }
   0x1 LB: > { %s524_s19 = sadd.s32 4294967295, %s591_s18   ;;  %p528_p0 = scmp.ge.s32.totalorder %s591_s18, 1  ;;  %s591_s18 = sphi %s626_s18, %s15_s18  }
   0x2   : > { %p187_p1 = scmp.lt.s32.totalorder %s591_s18, 3 }
   0x4   : > { %p188_p2 = pnand %p528_p0, %p187_p1 }
   0x5   : > { %p215_p3 = scmp.lt.s32.totalorder (!%p188_p2), %s524_s19, 1  ;;  %vm229_vm0 = vcmask (!%p188_p2), 130048   ;;  %v246_v8 = vld [vmem:[%s696_s1] sm:$0xff] (!%p188_p2)  ;;  %v247_v9 = vld [vmem:[%s696_s1 + $0x8] sm:$0xff] (!%p188_p2)  ;;  %v593_v10 = vmov (!%p188_p2), 0.0|0.0   ;;  %v248_v12 = vld [vmem:[%s696_s1 + $0x10] sm:$0xff] (!%p188_p2)  ;;  %v255_v16 = vlaneseq (!%p188_p2) }
   0x6   : > { %191 = sbr.rel (%p188_p2) target bundleno = 755 (0x2f3), region = 40  ;;  %564 = vmatprep.subr.bf16.mxu0 (!%p188_p2), %v593_v10  ;;  %v565_v11 = vpack.c.bf16 (!%p188_p2), %v247_v9, %v246_v8  ;;  %v249_v13 = vld [vmem:[%s696_s1 + $0x18] sm:$0xff] (!%p188_p2)  ;;  %vm594_vm1 = vmmov (!%p188_p2), 0   ;;  %v595_v15 = vmov (!%p188_p2), 0.0   ;;  %vm266_vm2 = vcmask (!%p188_p2), 130112  }
   0x7   : > { %v568_v14 = vpack.c.bf16 (!%p188_p2), %v249_v13, %v248_v12  ;;  %556 = vmatprep.mubr.msk.f32.mxu0 (!%p188_p2), %vm594_vm1, %v595_v15  ;;  %559 = vmatprep.subr.mxu1 (!%p188_p2), %v595_v15  ;;  %v256_v17 = vand.u32 (!%p188_p2), 127, %v255_v16  ;;  %v258_v18 = vshrl.u32 (!%p188_p2), %v255_v16, 7  ;;  %vm273_vm3 = vcmask (!%p188_p2), 195712   ;;  %v356_v41 = vld [vmem:[%s698_s3] sm:$0xf] (!%p188_p2) }
   0x8   : > { %566 = vmatpush3.bf16.msra.mxu0 (!%p188_p2), %v565_v11  ;;  %561 = vmatprep.mubr.msk.f32.mxu1 (!%p188_p2), %vm594_vm1, %v595_v15  ;;  %vm280_vm4 = vcmask (!%p188_p2), 261312   ;;  %vm282_vm5 = vcmask (!%p188_p2), 261120   ;;  %vm362_vm6 = vcmask (!%p188_p2), 1043456   ;;  %v250_v42 = vld [vmem:[%s697_s2] sm:$0x1] (!%p188_p2)  ;;  %vm358_vm7 = vcmask (!%p188_p2), 31744  }
   0x9   : > { %567 = vmatprep.subr.bf16.mxu0 (!%p188_p2), %v593_v10  ;;  %v261_v19 = vadd.s32 (!%p188_p2), 4294967288, %v256_v17  ;;  %v275_v20 = vadd.s32 (!%p188_p2), 4294967272, %v256_v17  ;;  %v268_v22 = vadd.s32 (!%p188_p2), 4294967280, %v256_v17  ;;  %v259_v24 = vsub.s32 (!%p188_p2), %v256_v17, %v258_v18  ;;  %560 = vmatpush3.msk.msra.mxu1 (!%p188_p2), %vm362_vm6, %v356_v41  ;;  %v357_v47 = vld [vmem:[%s699_s4] sm:$0x1] (!%p188_p2) }
   0xa   : > { %v444_v54 = vsub.s32 (!%p188_p2), 0, %v258_v18 }
   0xb   : > { %v264_v26 = vsub.s32 (!%p188_p2), %v261_v19, %v258_v18  ;;  %v278_v27 = vsub.s32 (!%p188_p2), %v275_v20, %v258_v18  ;;  %v271_v28 = vsub.s32 (!%p188_p2), %v268_v22, %v258_v18 }
   0xc   : > { %569 = vmatpush3.bf16.msra.mxu0 (!%p188_p2), %v568_v14 }
   0xd   : > { %s702_s19 = smov (!%p215_p3, %s524_s19), 1 }
   0xe   : > { %s539_s20 = sshll.u32 %s702_s19, 5 }
   0xf   : > { %s219_s23 = scalar_lea.vmem %s695_s0, %s539_s20  ;;  %s224_s15 = scalar_lea.vmem %s700_s5, %s539_s20 }
  0x10   : > { %v642_v0 = vld [vmem:[%s219_s23] sm:$0xff]  ;;  %v644_v1 = vld [vmem:[%s219_s23 + $0x10] sm:$0xff]  ;;  %v646_v2 = vld [vmem:[%s219_s23 + $0x8] sm:$0xff] }
  0x11   : > { %v230_v3 = vsel %vm229_vm0, %v642_v0, 0.0  ;;  %v236_v4 = vsel %vm229_vm0, %v644_v1, 0.0  ;;  %v652_v5 = vld [vmem:[%s219_s23 + $0x18] sm:$0xff]  ;;  %v233_v6 = vsel %vm229_vm0, %v646_v2, 0.0 }
  0x12   : > { %231 = vadd.xlane.f32.xlu0 %v230_v3  ;;  %237 = vadd.xlane.f32.xlu1 %v236_v4  ;;  %v239_v7 = vsel %vm229_vm0, %v652_v5, 0.0 }
  0x16   : > { %234 = vadd.xlane.f32.xlu0 %v233_v6  ;;  %240 = vadd.xlane.f32.xlu1 %v239_v7 }
  0x9f   : > { %v232_v21 = vpop.xlane.xlu0 %231  ;;  %v238_v23 = vpop.xlane.xlu1 %237 }
  0xa0   : > { %v242_v25 = vmul.f32 0.0625, %v232_v21  ;;  %v244_v29 = vmul.f32 0.0625, %v238_v23 }
  0xa2   : > { %v260_v34 = vrot.slane %v242_v25, %v259_v24  ;;  %v272_v37 = vrot.slane %v244_v29, %v271_v28 }
  0xa3   : > { %v235_v30 = vpop.xlane.xlu0 %234  ;;  %v241_v31 = vpop.xlane.xlu1 %240 }
  0xa4   : > { %v243_v32 = vmul.f32 0.0625, %v235_v30  ;;  %v245_v33 = vmul.f32 0.0625, %v241_v31 }
  0xa6   : > { %v265_v35 = vrot.slane %v243_v32, %v264_v26  ;;  %v279_v36 = vrot.slane %v245_v33, %v278_v27 }
  0xa8   : > { %v267_v38 = vsel %vm266_vm2, %v265_v35, %v260_v34 }
  0xa9   : > { %v274_v39 = vsel %vm273_vm3, %v272_v37, %v267_v38 }
  0xaa   : > { %v281_v40 = vsel %vm280_vm4, %v279_v36, %v274_v39 }
  0xab   : > { %557 = vmatmul.mubr.msk.f32.vlgmr.msra.gmra.mrb[0].mxu0 %vm282_vm5, %v281_v40 }
 0x17e   : > { %v351_v43 = vpop.f32.mrb[0].mxu0 }
 0x17f   : > { %v352_v44 = vadd.f32 %v351_v43, %v250_v42  ;;  %v558_v45 = vpop.f32.mrb[1].mxu0 }
 0x181   : > { %v355_v46 = vmax.f32 %v352_v44, 0.0 }
 0x183   : > { %562 = vmatmul.mubr.msk.f32.vlgmr.msra.gmra.mrb[0].mxu1 %vm358_vm7, %v355_v46 }
 0x256   : > { %v432_v48 = vpop.f32.mrb[0].mxu1 }
 0x257   : > { %v433_v49 = vadd.f32 %v432_v48, %v357_v47  ;;  %v563_v50 = vpop.f32.mrb[1].mxu1 }
 0x259   : > { %v536_v51 = vmul.f32 -1.442695, %v433_v49 }
 0x25b   : > { %581 = vpow2.f32 %v536_v51 }
 0x265   : > { %v582_v52 = vpop.eup %581 }
 0x266   : > { %v439_v53 = vadd.f32 1.0, %v582_v52 }
 0x268   : > { %583 = vrcp.f32 %v439_v53 }
 0x272   : > { %v584_v55 = vpop.eup %583 }
 0x273   : > { %v445_v56 = vrot.slane %v584_v55, %v444_v54 }
 0x275   : > { %451 = vbcast.lane.b32.xlu1 %v445_v56, 264  ;;  %447 = vbcast.lane.b32.xlu0 %v445_v56, 256 }
 0x279   : > { %455 = vbcast.lane.b32.xlu1 %v445_v56, 272 }
 0x27d   : > { %459 = vbcast.lane.b32.xlu1 %v445_v56, 280 }
 0x2e7   : > { %v452_v57 = vpop.permute.xlu1 %451  ;;  %v448_v58 = vpop.permute.xlu0 %447 }
 0x2e8   : > { %v462_v59 = vmul.f32 %v452_v57, %v646_v2  ;;  %v461_v60 = vmul.f32 %v448_v58, %v642_v0 }
 0x2ea   : > { %466 = vst.msk [vmem:[%s224_s15 + $0x8] sm:$0xff] %vm229_vm0, %v462_v59  ;;  %465 = vst.msk [vmem:[%s224_s15] sm:$0xff] %vm229_vm0, %v461_v60 }
 0x2eb   : > { %v456_v61 = vpop.permute.xlu1 %455 }
 0x2ec   : > { %v463_v62 = vmul.f32 %v456_v61, %v644_v1 }
 0x2ee   : > { %467 = vst.msk [vmem:[%s224_s15 + $0x10] sm:$0xff] %vm229_vm0, %v463_v62 }
 0x2ef   : > { %v460_v63 = vpop.permute.xlu1 %459 }
 0x2f0   : > { %v464_v3 = vmul.f32 %v460_v63, %v652_v5 }
 0x2f2   : > { %468 = vst.msk [vmem:[%s224_s15 + $0x18] sm:$0xff] %vm229_vm0, %v464_v3 }
 0x2f3 PF: > { %s15_s18 = sadd.s32 1, %s591_s18  }
 0x2f4   : > { %p12_p4 = scmp.ge.s32.totalorder %s15_s18, 4  }
 0x2f6   :  { %14 = sbr.rel (!%p12_p4) target bundleno = 1 (0x1), region = 70 }

</bundles_post_ra>
